<compile_context>
chip_gen: v7x
topology: tpu7x:2x2x1
jax: 0.10.0
libtpu: 0.0.40
codegen_flags: <defaults>
</compile_context>

<pallas_src>
import functools

import jax
import jax.numpy as jnp
from jax.experimental import pallas as pl
from jax.experimental.pallas import tpu as pltpu


# ---------------------------------------------------------------------------
# VMEM budgeting / tile selection
# ---------------------------------------------------------------------------
def _vmem_budget():
    """(compiler vmem_limit_bytes, tile-sizing budget) from the actual chip."""
    try:
        cap = int(pltpu.get_tpu_info().vmem_capacity_bytes)
    except Exception:
        cap = 64 * 1024 * 1024  # conservative: v7x per-core VMEM
    vmem_limit = min((cap * 3) // 4, 100 * 1024 * 1024)
    tile_budget = cap // 2  # headroom for double buffers / scratch
    return vmem_limit, tile_budget


def _choose_tile_l(L_pad, channels, itemsize, budget_bytes, max_tile=16384):
    """Largest lane-dense (multiple-of-128) tile along L that divides L_pad
    and fits the per-step VMEM budget."""
    c_in, c_out = channels[0], channels[-1]
    c_max = max(channels)
    # bytes per L column per grid step:
    #   double-buffered x tile + double-buffered y tile + f32 intermediates.
    per_col = 2 * c_in * itemsize + 2 * c_out * itemsize + 4 * (c_max + c_out)
    cap = max(128, (budget_bytes // max(per_col, 1)) // 128 * 128)
    cap = min(cap, max_tile, L_pad)
    best = min(128, L_pad)
    t = 128
    while t <= cap:
        if L_pad % t == 0:
            best = t
        t += 128
    return best


# ---------------------------------------------------------------------------
# Pallas kernels
# ---------------------------------------------------------------------------
def _mlp_stack(x_ref, wb_refs, num_layers, apply_relu):
    """Pointwise Conv1d stack (+optional ReLU) on one (C_in, TL) tile, f32."""
    h = x_ref[...].astype(jnp.float32)
    for i in range(num_layers):
        w = wb_refs[2 * i][...].astype(jnp.float32)        # (C_out_i, C_in_i)
        b = wb_refs[2 * i + 1][...].astype(jnp.float32)    # (C_out_i, 1)
        h = jnp.dot(w, h, preferred_element_type=jnp.float32) + b
        if apply_relu:
            h = jnp.maximum(h, 0.0)
    return h                                               # (C_out, TL)


def _mlp_fwd_kernel(x_ref, *rest, num_layers, apply_relu):
    wb_refs, y_ref = rest[:-1], rest[-1]
    h = _mlp_stack(x_ref, wb_refs, num_layers, apply_relu)
    y_ref[...] = h.astype(y_ref.dtype)                     # lane-dense store


def _mlp_stats_kernel(x_ref, *rest, num_layers, apply_relu, tile_l, l_valid):
    """Stats-only pass: per-(n,l) partial sum / sum-of-squares, no y write."""
    wb_refs = rest[:-2]
    sum_ref, ssq_ref = rest[-2:]
    h = _mlp_stack(x_ref, wb_refs, num_layers, apply_relu)
    if l_valid is not None:  # L was padded -> mask padded columns out of stats
        col = (jax.lax.broadcasted_iota(jnp.int32, h.shape, 1)
               + pl.program_id(1) * tile_l)
        hm = jnp.where(col < l_valid, h, 0.0)
    else:
        hm = h
    sum_ref[...] = jnp.sum(hm, axis=-1, keepdims=True)
    ssq_ref[...] = jnp.sum(hm * hm, axis=-1, keepdims=True)


def _mlp_norm_kernel(x_ref, scale_ref, shift_ref, *rest, num_layers, apply_relu):
    """Recompute the stack and apply the folded BN scale/shift as an epilogue
    (on the unrounded f32 activations), writing the final output directly."""
    wb_refs, y_ref = rest[:-1], rest[-1]
    h = _mlp_stack(x_ref, wb_refs, num_layers, apply_relu)
    y_ref[...] = (h * scale_ref[...] + shift_ref[...]).astype(y_ref.dtype)


# ---------------------------------------------------------------------------
# Forward pass (mirror of the PyTorch `mlp` module)
# ---------------------------------------------------------------------------
def mlp_forward(x, params, bn_params=None, activation_relu=False, bn=False,
                eps=1e-5, tile_l=None):
    """x: (N, C_in, L) -> (N, C_last, L).  params: list of (W (Cout,Cin), b (Cout,1))."""
    N, C_in, L = x.shape
    out_dtype = x.dtype

    # activation=None: pre-compose the pure-linear stack into one layer.
    if (not activation_relu) and len(params) > 1:
        W_eff = params[0][0].astype(jnp.float32)
        b_eff = params[0][1].astype(jnp.float32)
        for (w, b) in params[1:]:
            w32, b32 = w.astype(jnp.float32), b.astype(jnp.float32)
            W_eff = w32 @ W_eff
            b_eff = w32 @ b_eff + b32
        params = [(W_eff, b_eff)]

    num_layers = len(params)
    C_out = params[-1][0].shape[0]
    channels = [C_in] + [w.shape[0] for (w, _) in params]

    # Pad L to a multiple of 128 so every tile is lane-dense and unmasked.
    L_pad = ((L + 127) // 128) * 128
    ragged = (L_pad != L)
    if ragged:
        x = jnp.pad(x, ((0, 0), (0, 0), (0, L_pad - L)))

    vmem_limit, tile_budget = _vmem_budget()
    TL = tile_l if tile_l is not None else _choose_tile_l(
        L_pad, channels, jnp.dtype(x.dtype).itemsize, tile_budget)
    assert L_pad % TL == 0
    num_l = L_pad // TL

    wb_inputs, wb_specs = [], []
    for (w, b) in params:
        wb_inputs += [w, b]
        wb_specs += [
            pl.BlockSpec(tuple(w.shape), lambda n, l: (0, 0)),   # VMEM-resident
            pl.BlockSpec(tuple(b.shape), lambda n, l: (0, 0)),
        ]

    x_spec = pl.BlockSpec((None, C_in, TL), lambda n, l: (n, 0, l))
    y_spec = pl.BlockSpec((None, C_out, TL), lambda n, l: (n, 0, l))
    cparams = pltpu.CompilerParams(
        dimension_semantics=("parallel", "parallel"),
        vmem_limit_bytes=vmem_limit)

    if not bn:
        kernel = functools.partial(_mlp_fwd_kernel, num_layers=num_layers,
                                   apply_relu=activation_relu)
        y = pl.pallas_call(
            kernel,
            out_shape=jax.ShapeDtypeStruct((N, C_out, L_pad), out_dtype),
            grid=(N, num_l),
            in_specs=[x_spec] + wb_specs,
            out_specs=y_spec,
            compiler_params=cparams,
        )(x, *wb_inputs)
        return y[:, :, :L] if ragged else y

    # ---- bn=True: (1) stats-only pass, per-(n,l) partials, fully parallel ----
    stats_kernel = functools.partial(
        _mlp_stats_kernel, num_layers=num_layers, apply_relu=activation_relu,
        tile_l=TL, l_valid=(L if ragged else None))
    part_spec = pl.BlockSpec((None, None, C_out, 1), lambda n, l: (n, l, 0, 0))
    psum, pssq = pl.pallas_call(
        stats_kernel,
        out_shape=(jax.ShapeDtypeStruct((N, num_l, C_out, 1), jnp.float32),
                   jax.ShapeDtypeStruct((N, num_l, C_out, 1), jnp.float32)),
        grid=(N, num_l),
        in_specs=[x_spec] + wb_specs,
        out_specs=(part_spec, part_spec),
        compiler_params=cparams,
    )(x, *wb_inputs)

    # Tiny reduction + BN folding in plain JAX (train-mode batch statistics,
    # biased variance, matching nn.BatchNorm1d's training normalization).
    gamma, beta = bn_params
    m = jnp.float32(N * L)
    total_sum = jnp.sum(psum, axis=(0, 1))                 # (C_out, 1)
    total_ssq = jnp.sum(pssq, axis=(0, 1))                 # (C_out, 1)
    mean = total_sum / m
    # TODO(synk): E[x^2]-mean^2 in f32 can lose precision when |mean| >> std;
    # a second centered pass would be more robust (extra read of x).
    var = jnp.maximum(total_ssq / m - mean * mean, 0.0)
    scale = gamma.astype(jnp.float32) * jax.lax.rsqrt(var + eps)
    shift = beta.astype(jnp.float32) - mean * scale

    # ---- (2) recompute + normalize pass: writes the final output directly ----
    norm_kernel = functools.partial(_mlp_norm_kernel, num_layers=num_layers,
                                    apply_relu=activation_relu)
    stat_in_spec = pl.BlockSpec((C_out, 1), lambda n, l: (0, 0))
    y = pl.pallas_call(
        norm_kernel,
        out_shape=jax.ShapeDtypeStruct((N, C_out, L_pad), out_dtype),
        grid=(N, num_l),
        in_specs=[x_spec, stat_in_spec, stat_in_spec] + wb_specs,
        out_specs=y_spec,
        compiler_params=cparams,
    )(x, scale, shift, *wb_inputs)
    return y[:, :, :L] if ragged else y


# ---------------------------------------------------------------------------
# Parameter init (Conv1d(pre, layer, 1): weight (layer, pre), bias (layer, 1))
# ---------------------------------------------------------------------------
def init_mlp_params(key, mlp_channels, channel_in):
    params = []
    pre = channel_in
    for layer in mlp_channels:
        key, kw, kb = jax.random.split(key, 3)
        bound = 1.0 / float(pre) ** 0.5
        w = jax.random.uniform(kw, (layer, pre), jnp.float32, -bound, bound)
        b = jax.random.uniform(kb, (layer, 1), jnp.float32, -bound, bound)
        params.append((w, b))
        pre = layer
    bn_params = (jnp.ones((pre, 1), jnp.float32), jnp.zeros((pre, 1), jnp.float32))
    return params, bn_params


def _ref_stack(x, params, relu):
    h = x
    for (w, b) in params:
        h = jnp.einsum('oc,ncl->nol', w, h) + b[None]
        if relu:
            h = jnp.maximum(h, 0.0)
    return h


def _ref_bn(h, gamma, beta, eps=1e-5):
    mean = h.mean(axis=(0, 2), keepdims=True)
    var = ((h - mean) ** 2).mean(axis=(0, 2), keepdims=True)
    return (h - mean) * jax.lax.rsqrt(var + eps) * gamma[None] + beta[None]


# ---------------------------------------------------------------------------
if __name__ == "__main__":
    key = jax.random.PRNGKey(0)
    key, kx, kx2, kg, kb = jax.random.split(key, 5)

    # Module config: mlp([32, 64], channel_in=4, activation=nn.ReLU)
    mlp_channels = [32, 64]
    channel_in = 4
    N, L = 2, 256

    params, bn_params = init_mlp_params(key, mlp_channels, channel_in)
    x = jax.random.normal(kx, (N, channel_in, L), jnp.float32)

    # --- Path 1: activation=ReLU, bn=False --------------------------------
    ref = _ref_stack(x, params, relu=True)
    out = jax.block_until_ready(mlp_forward(x, params, activation_relu=True, bn=False))
    assert out.shape == (N, mlp_channels[-1], L)
    assert jnp.allclose(out, ref, atol=1e-5, rtol=1e-5)

    # --- Path 2: activation=ReLU, bn=True (train-mode batch stats) --------
    out_bn = jax.block_until_ready(
        mlp_forward(x, params, bn_params, activation_relu=True, bn=True))
    ref_bn = _ref_bn(ref, *bn_params)
    assert out_bn.shape == (N, mlp_channels[-1], L)
    assert jnp.allclose(out_bn, ref_bn, atol=1e-4, rtol=1e-4)

    # --- Path 3: activation=None, bn=False (pre-composed single matmul) ---
    ref_lin = _ref_stack(x, params, relu=False)
    out_lin = jax.block_until_ready(mlp_forward(x, params, activation_relu=False, bn=False))
    assert jnp.allclose(out_lin, ref_lin, atol=1e-4, rtol=1e-4)

    # --- Path 4: ragged L (not a multiple of 128), ReLU + BN --------------
    L2 = 200
    x2 = jax.random.normal(kx2, (N, channel_in, L2), jnp.float32)
    gamma2 = 1.0 + 0.1 * jax.random.normal(kg, (mlp_channels[-1], 1), jnp.float32)
    beta2 = 0.1 * jax.random.normal(kb, (mlp_channels[-1], 1), jnp.float32)
    out_r = jax.block_until_ready(
        mlp_forward(x2, params, (gamma2, beta2), activation_relu=True, bn=True))
    ref_r = _ref_bn(_ref_stack(x2, params, relu=True), gamma2, beta2)
    assert out_r.shape == (N, mlp_channels[-1], L2)
    assert jnp.allclose(out_r, ref_r, atol=1e-4, rtol=1e-4)

    print("KERNEL_OK")
</pallas_src>

<mosaic_0001>
module attributes {stable_mosaic.version = 11 : i64} {
  func.func @_mlp_fwd_kernel(%arg0: i32, %arg1: i32, %arg2: memref<1x4x256xf32, #tpu.memory_space<vmem>>, %arg3: memref<32x4xf32, #tpu.memory_space<vmem>>, %arg4: memref<32x1xf32, #tpu.memory_space<vmem>>, %arg5: memref<64x32xf32, #tpu.memory_space<vmem>>, %arg6: memref<64x1xf32, #tpu.memory_space<vmem>>, %arg7: memref<1x64x256xf32, #tpu.memory_space<vmem>>) attributes {dimension_semantics = [#tpu.dimension_semantics<parallel>, #tpu.dimension_semantics<parallel>], iteration_bounds = array<i64: 2, 1>, scalar_prefetch = 0 : i64, scratch_operands = 0 : i64, tpu.core_type = #tpu.core_type<tc>, window_params = [{transform_indices = @transform_0, window_bounds = array<i64: 1, 4, 256>}, {pipeline_mode = #tpu.pipeline_mode<synchronous>, transform_indices = @transform_1, window_bounds = array<i64: 32, 4>}, {pipeline_mode = #tpu.pipeline_mode<synchronous>, transform_indices = @transform_2, window_bounds = array<i64: 32, 1>}, {pipeline_mode = #tpu.pipeline_mode<synchronous>, transform_indices = @transform_3, window_bounds = array<i64: 64, 32>}, {pipeline_mode = #tpu.pipeline_mode<synchronous>, transform_indices = @transform_4, window_bounds = array<i64: 64, 1>}, {transform_indices = @transform_5, window_bounds = array<i64: 1, 64, 256>}]} {
    %c0 = arith.constant 0 : index
    %c0_0 = arith.constant 0 : index
    %c0_1 = arith.constant 0 : index
    %0 = vector.load %arg2[%c0, %c0_0, %c0_1] : memref<1x4x256xf32, #tpu.memory_space<vmem>>, vector<1x4x256xf32>
    %1 = vector.shape_cast %0 : vector<1x4x256xf32> to vector<4x256xf32>
    %c0_2 = arith.constant 0 : index
    %c0_3 = arith.constant 0 : index
    %2 = vector.load %arg3[%c0_2, %c0_3] : memref<32x4xf32, #tpu.memory_space<vmem>>, vector<32x4xf32>
    %c0_4 = arith.constant 0 : index
    %c0_5 = arith.constant 0 : index
    %3 = vector.load %arg4[%c0_4, %c0_5] : memref<32x1xf32, #tpu.memory_space<vmem>>, vector<32x1xf32>
    %cst = arith.constant dense<0.000000e+00> : vector<32x256xf32>
    %4 = tpu.matmul %2, %1, %cst {dimension_numbers = #tpu.dot_dimension_numbers<[1], [0], [0], [1], [0, 0, 1, 1], [], []>} : vector<32x4xf32>, vector<4x256xf32>, vector<32x256xf32> -> vector<32x256xf32>
    %5 = vector.broadcast %3 : vector<32x1xf32> to vector<32x256xf32>
    %6 = arith.addf %4, %5 : vector<32x256xf32>
    %cst_6 = arith.constant 0.000000e+00 : f32
    %7 = vector.broadcast %cst_6 : f32 to vector<32x256xf32>
    %8 = arith.maximumf %6, %7 : vector<32x256xf32>
    %c0_7 = arith.constant 0 : index
    %c0_8 = arith.constant 0 : index
    %9 = vector.load %arg5[%c0_7, %c0_8] : memref<64x32xf32, #tpu.memory_space<vmem>>, vector<64x32xf32>
    %c0_9 = arith.constant 0 : index
    %c0_10 = arith.constant 0 : index
    %10 = vector.load %arg6[%c0_9, %c0_10] : memref<64x1xf32, #tpu.memory_space<vmem>>, vector<64x1xf32>
    %cst_11 = arith.constant dense<0.000000e+00> : vector<64x256xf32>
    %11 = tpu.matmul %9, %8, %cst_11 {dimension_numbers = #tpu.dot_dimension_numbers<[1], [0], [0], [1], [0, 0, 1, 1], [], []>} : vector<64x32xf32>, vector<32x256xf32>, vector<64x256xf32> -> vector<64x256xf32>
    %12 = vector.broadcast %10 : vector<64x1xf32> to vector<64x256xf32>
    %13 = arith.addf %11, %12 : vector<64x256xf32>
    %cst_12 = arith.constant 0.000000e+00 : f32
    %14 = vector.broadcast %cst_12 : f32 to vector<64x256xf32>
    %15 = arith.maximumf %13, %14 : vector<64x256xf32>
    %c0_13 = arith.constant 0 : index
    %c0_14 = arith.constant 0 : index
    %c0_15 = arith.constant 0 : index
    %16 = vector.load %arg7[%c0_13, %c0_14, %c0_15] : memref<1x64x256xf32, #tpu.memory_space<vmem>>, vector<1x64x256xf32>
    %17 = vector.shape_cast %16 : vector<1x64x256xf32> to vector<64x256xf32>
    %18 = vector.shape_cast %15 : vector<64x256xf32> to vector<1x64x256xf32>
    tpu.vector_store %arg7[%c0_13, %c0_14, %c0_15], %18 {strides = array<i32>} : memref<1x64x256xf32, #tpu.memory_space<vmem>>, vector<1x64x256xf32>,
    return
  }
  func.func @transform_0(%arg0: i32, %arg1: i32) -> (i32, i32, i32) {
    %c0_i32 = arith.constant 0 : i32
    %c0_i32_0 = arith.constant 0 : i32
    return %arg0, %c0_i32, %arg1 : i32, i32, i32
  }
  func.func @transform_1(%arg0: i32, %arg1: i32) -> (i32, i32) {
    %c0_i32 = arith.constant 0 : i32
    %c0_i32_0 = arith.constant 0 : i32
    %c0_i32_1 = arith.constant 0 : i32
    return %c0_i32, %c0_i32_0 : i32, i32
  }
  func.func @transform_2(%arg0: i32, %arg1: i32) -> (i32, i32) {
    %c0_i32 = arith.constant 0 : i32
    %c0_i32_0 = arith.constant 0 : i32
    %c0_i32_1 = arith.constant 0 : i32
    return %c0_i32, %c0_i32_0 : i32, i32
  }
  func.func @transform_3(%arg0: i32, %arg1: i32) -> (i32, i32) {
    %c0_i32 = arith.constant 0 : i32
    %c0_i32_0 = arith.constant 0 : i32
    %c0_i32_1 = arith.constant 0 : i32
    return %c0_i32, %c0_i32_0 : i32, i32
  }
  func.func @transform_4(%arg0: i32, %arg1: i32) -> (i32, i32) {
    %c0_i32 = arith.constant 0 : i32
    %c0_i32_0 = arith.constant 0 : i32
    %c0_i32_1 = arith.constant 0 : i32
    return %c0_i32, %c0_i32_0 : i32, i32
  }
  func.func @transform_5(%arg0: i32, %arg1: i32) -> (i32, i32, i32) {
    %c0_i32 = arith.constant 0 : i32
    %c0_i32_0 = arith.constant 0 : i32
    return %arg0, %c0_i32, %arg1 : i32, i32, i32
  }
}

</mosaic_0001>

<bundles_post_ra>
// kernel: tpu_custom_call.1
= control target key start
LH: loop header
LB: loop body
LE: loop exit
PB: predicated region body
PF: predicated region fallthrough
CT: control target
= control target key end

     0   :  { %10 = vsyncpa [#allocation3], 0  ;;  %s1173_s0 = inlined_call_operand.vmem [shape: f32[2,4,256], index: 0, kind: input, shape index: {}]   ;;  %s1174_s1 = inlined_call_operand.vmem [shape: f32[32,4], index: 1, kind: input, shape index: {}]   ;;  %s1175_s2 = inlined_call_operand.vmem [shape: f32[32,1], index: 2, kind: input, shape index: {}]   ;;  %s1176_s3 = inlined_call_operand.vmem [shape: f32[64,32], index: 3, kind: input, shape index: {}]   ;;  %s1177_s4 = inlined_call_operand.vmem [shape: f32[64,1], index: 4, kind: input, shape index: {}]   ;;  %s1178_s5 = inlined_call_operand.hbm [shape: f32[2,64,256], index: 5, kind: output, shape index: {}]  }
   0x1   :  { %12 = vsyncpa [#allocation3 + $0x1], 0  ;;  %s939_s18 = smov 0   ;;  %s941_s19 = smov 0  }
   0x2   :  { %s943_s20 = smov 0   ;;  %s945_s21 = smov 0  }
   0x3   :  { %s947_s22 = smov 0   ;;  %s949_s23 = smov 0  }
   0x4 LB: > { %s721_s24 = sadd.s32 4294967295, %s902_s23   ;;  %s722_s25 = sadd.s32 4294967294, %s902_s23   ;;  %s902_s23 = sphi %s949_s23, %s18_s23   ;;  %s898_s22 = sphi %s947_s22, %s1185_s22   ;;  %s894_s21 = sphi %s945_s21, %s1184_s21   ;;  %s890_s20 = sphi %s943_s20, %s1183_s20   ;;  %s886_s19 = sphi %s941_s19, %s1182_s19   ;;  %s882_s18 = sphi %s939_s18, %s1181_s18  }
   0x5   : > { %s30_s26 = sadd.s32 1, %s898_s22  ;;  %s151_s27 = sadd.s32 1, %s890_s20 }
   0x6   : > { %p32_p0 = scmp.ge.s32.totalorder %s30_s26, 2  ;;  %p161_p1 = scmp.ne.s32.totalorder %s890_s20, %s886_s19 }
   0x7   : > { %p162_p2 = scmp.eq.s32.totalorder %s721_s24, 1  ;;  %p167_p3 = scmp.ne.s32.totalorder %s886_s19, %s882_s18 }
   0x8   : > { %s1187_s26 = smov (%p32_p0, %s30_s26), 0  ;;  %p168_p5 = scmp.eq.s32.totalorder %s722_s25, 1 }
   0x9   : > { %p979_p4 = por %p162_p2, %p161_p1  ;;  %s146_s29 = ssub.s32 %s898_s22, %s1187_s26 }
   0xa   : > { %p725_p6 = scmp.ge.s32.totalorder %s902_s23, 1  ;;  %p149_p7 = scmp.eq.s32.totalorder %s146_s29, 0 }
   0xb   : > { %p986_p8 = por %p168_p5, %p167_p3  ;;  %p211_p9 = scmp.lt.s32.totalorder %s902_s23, 3 }
   0xc   : > { %s992_s6 = scalar_select %p149_p7, %s890_s20, %s151_s27  }
   0xd   : > { %p212_p10 = pnand %p725_p6, %p211_p9 }
   0xe   : > { %p244_p11 = scmp.lt.s32.totalorder (!%p212_p10), %s894_s21, 1  ;;  %v904_v0 = vmov (!%p212_p10), 0.0   ;;  %v259_v1 = vld [vmem:[%s1175_s2] sm:$0xff] (!%p212_p10)  ;;  %v905_v2 = vmov (!%p212_p10), 0   ;;  %v261_v3 = vld [vmem:[%s1175_s2 + $0x10] sm:$0xff] (!%p212_p10)  ;;  %v260_v4 = vld [vmem:[%s1175_s2 + $0x8] sm:$0xff] (!%p212_p10) }
   0xf   : > { %215 = sbr.rel (%p212_p10) target bundleno = 518 (0x206), region = 40  ;;  %367 = vmatprep.mubr.f32.mxu0 (!%p212_p10), %v904_v0  ;;  %557 = vmatprep.mubr.f32.mxu1 (!%p212_p10), %v904_v0  ;;  %v262_v5 = vld [vmem:[%s1175_s2 + $0x18] sm:$0xff] (!%p212_p10)  ;;  %vm298_vm0 = vcmask (!%p212_p10), 1043456   ;;  %v255_v8 = vld [vmem:[%s1174_s1] sm:$0xff] (!%p212_p10)  ;;  %vm285_vm1 = vcmask (!%p212_p10), 31744   ;;  %v409_v10 = vld [vmem:[%s1177_s4 + $0x8] sm:$0xff] (!%p212_p10) }
  0x10   : > { %821 = vset.pattern.permute.xlu0 (!%p212_p10), %v905_v2  ;;  %822 = vset.pattern.permute.xlu1 (!%p212_p10), %v905_v2  ;;  %v408_v9 = vld [vmem:[%s1177_s4] sm:$0xff] (!%p212_p10)  ;;  %v256_v11 = vld [vmem:[%s1174_s1 + $0x8] sm:$0xff] (!%p212_p10)  ;;  %v410_v12 = vld [vmem:[%s1177_s4 + $0x10] sm:$0xff] (!%p212_p10)  ;;  %vm456_vm2 = vcmask (!%p212_p10), 261120   ;;  %s240_s15 = sand.u32 (!%p212_p10), 1, %s886_s19   ;;  %s749_s24 = sshll.u32 (!%p212_p10), %s894_s21, 11 }
  0x11   : > { %265 = vperm.xlu0 (!%p212_p10), %821, %v259_v1   ;;  %275 = vperm.xlu1 (!%p212_p10), %822, %v261_v3   ;;  %v411_v13 = vld [vmem:[%s1177_s4 + $0x18] sm:$0xff] (!%p212_p10)  ;;  %v257_v14 = vld [vmem:[%s1174_s1 + $0x10] sm:$0xff] (!%p212_p10)  ;;  %v412_v15 = vld [vmem:[%s1177_s4 + $0x20] sm:$0xff] (!%p212_p10)  ;;  %s726_s16 = sshll.u32 (!%p212_p10), %s240_s15, 7  ;;  %s1119_s7 = scalar_lea.hbm (!%p212_p10), %s1178_s5, %s749_s24 }
  0x12   : > { %v413_v16 = vld [vmem:[%s1177_s4 + $0x28] sm:$0xff] (!%p212_p10)  ;;  %v258_v17 = vld [vmem:[%s1174_s1 + $0x18] sm:$0xff] (!%p212_p10)  ;;  %v414_v18 = vld [vmem:[%s1177_s4 + $0x30] sm:$0xff] (!%p212_p10)  ;;  %s1098_s17 = scalar_lea.vmem (!%p212_p10), [#allocation2], %s726_s16 }
  0x13   : > { %v415_v19 = vld [vmem:[%s1177_s4 + $0x38] sm:$0xff] (!%p212_p10)  ;;  %v400_v52 = vld [vmem:[%s1176_s3] sm:$0xff] (!%p212_p10)  ;;  %v402_v53 = vld [vmem:[%s1176_s3 + $0x10] sm:$0xff] (!%p212_p10) }
  0x14   : > { %v401_v54 = vld [vmem:[%s1176_s3 + $0x8] sm:$0xff] (!%p212_p10)  ;;  %v403_v55 = vld [vmem:[%s1176_s3 + $0x18] sm:$0xff] (!%p212_p10)  ;;  %v404_v56 = vld [vmem:[%s1176_s3 + $0x20] sm:$0xff] (!%p212_p10) }
  0x15   : > { %270 = vperm.xlu0 (!%p212_p10), %821, %v260_v4   ;;  %280 = vperm.xlu1 (!%p212_p10), %822, %v262_v5   ;;  %v405_v57 = vld [vmem:[%s1176_s3 + $0x28] sm:$0xff] (!%p212_p10)  ;;  %v406_v58 = vld [vmem:[%s1176_s3 + $0x30] sm:$0xff] (!%p212_p10)  ;;  %v407_v59 = vld [vmem:[%s1176_s3 + $0x38] sm:$0xff] (!%p212_p10) }
  0x16   : > { %s245_s9 = scalar_select %p244_p11, %s894_s21, 1 }
  0x17   : > { %s1127_s21 = scalar_lea.sflag [#allocation3], %s240_s15 }
  0x18   : > { %s748_s12 = sshll.u32 %s245_s9, 3  ;;  %s906_s9 = smov [#allocation2]  }
  0x19   : > { %s251_s25 = scalar_lea.vmem %s1173_s0, %s748_s12  ;;  %418 = vperm.xlu0 %821, %v408_v9   ;;  %423 = vperm.xlu1 %822, %v409_v10   ;;  %s828_s10 = sshll.u32 %s906_s9, 4  ;;  %s829_s10 = int_to_ptr.vmem [resolvable:$false] %s828_s10 }
  0x1a   : > { %v254_v6 = vld [vmem:[%s251_s25] sm:$0xff]  ;;  %s642_s25 = sshll.u32 %s1098_s17, 4  ;;  %s830_s11 = scalar_lea.vmem %s829_s10, 4096  ;;  %s1121_s25 = int_to_ptr.vmem [resolvable:$true] %s642_s25 }
  0x1b   : > { %v284_v7 = vcombine.high %v254_v6, %v254_v6  ;;  %s824_s8 = scalar_lea.vmem %s1121_s25, 2048  ;;  %p831_p1 = scmp.lt.s32.totalorder %s1121_s25, %s829_s10 }
  0x1c   : > { %p825_p12 = scmp.ne.s32.totalorder %s1121_s25, %s824_s8  ;;  %p832_p2 = scmp.lt.s32.totalorder %s830_s11, %s824_s8 }
  0x1d   : > { %729 = vmatprep.subr.msk.mxu0 %vm298_vm0, %v284_v7  ;;  %428 = vperm.xlu0 %821, %v410_v12  }
  0x1e   : > { %730 = vmatpush1.msk.msra.mxu0 %vm298_vm0, %v254_v6  ;;  %433 = vperm.xlu1 %822, %v411_v13   ;;  %p826_p13 = pnand %p825_p12, %p979_p4  ;;  %p833_p3 = por %p832_p2, %p831_p1 }
  0x1f   : > { %731 = vmatmul.mubr.msk.f32.vlgmr.msra.gmra.mrb[0].mxu0 %vm285_vm1, %v255_v8 }
  0x20   : > { %373 = vmatprep.mubr.f32.mxu0 %v904_v0  ;;  %p827_p0 = pneg %p826_p13 }
  0x21   : > { %438 = vperm.xlu0 %821, %v412_v15  }
  0x22   : > { %443 = vperm.xlu1 %822, %v413_v16   ;;  %p834_p5 = pnand %p833_p3, %p827_p0 }
  0x23   : > { %732 = vmatmul.mubr.msk.f32.gmra.mrb[2].mxu0 %vm285_vm1, %v256_v11 }
  0x24   : > { %379 = vmatprep.mubr.f32.mxu0 %v904_v0 }
  0x25   : > { %448 = vperm.xlu0 %821, %v414_v18  }
  0x26   : > { %453 = vperm.xlu1 %822, %v415_v19  }
  0x27   : > { %733 = vmatmul.mubr.msk.f32.gmra.mrb[4].mxu0 %vm285_vm1, %v257_v14 }
  0x28   : > { %385 = vmatprep.mubr.f32.mxu0 %v904_v0 }
  0x2b   : > { %734 = vmatmul.mubr.msk.f32.gmra.mrb[6].mxu0 %vm285_vm1, %v258_v17 }
  0x2c   : > { %545 = vmatprep.mubr.f32.mxu0 %v904_v0 }
  0x90   : > { %v266_v20 = vpop.permute.xlu0 %265  ;;  %v276_v29 = vpop.permute.xlu1 %275 }
  0x94   : > { %v271_v24 = vpop.permute.xlu0 %270  ;;  %v281_v40 = vpop.permute.xlu1 %280 }
  0x98   : > { %v419_v60 = vpop.permute.xlu0 %418  ;;  %v424_v61 = vpop.permute.xlu1 %423 }
  0x9c   : > { %v429_v62 = vpop.permute.xlu0 %428 }
  0x9d   : > { %v434_v7 = vpop.permute.xlu1 %433 }
  0xf2   : > { %v369_v21 = vpop.f32.mrb[0].mxu0 }
  0xf3   : > { %v371_v22 = vpop.f32.mrb[1].mxu0  ;;  %v370_v23 = vadd.f32 %v369_v21, %v266_v20 }
  0xf4   : > { %v372_v25 = vadd.f32 %v371_v22, %v266_v20  ;;  %v439_v22 = vpop.permute.xlu0 %438 }
  0xf5   : > { %v392_v31 = vmax.f32 %v370_v23, 0.0 }
  0xf6   : > { %v375_v26 = vpop.f32.mrb[2].mxu0  ;;  %v393_v33 = vmax.f32 %v372_v25, 0.0 }
  0xf7   : > { %v376_v27 = vadd.f32 %v375_v26, %v271_v24  ;;  %v377_v28 = vpop.f32.mrb[3].mxu0 }
  0xf8   : > { %v378_v30 = vadd.f32 %v377_v28, %v271_v24 }
  0xf9   : > { %v394_v32 = vmax.f32 %v376_v27, 0.0 }
  0xfa   : > { %v395_v34 = vmax.f32 %v378_v30, 0.0  ;;  %v381_v35 = vpop.f32.mrb[4].mxu0  ;;  %v444_v30 = vpop.permute.xlu1 %443 }
  0xfb   : > { %v752_v36 = vpack.c.bf16 %v394_v32, %v392_v31  ;;  %v383_v37 = vpop.f32.mrb[5].mxu0  ;;  %v382_v39 = vadd.f32 %v381_v35, %v276_v29 }
  0xfc   : > { %v750_v38 = vpack.c.bf16 %v395_v34, %v393_v33  ;;  %v384_v41 = vadd.f32 %v383_v37, %v276_v29  ;;  %v449_v37 = vpop.permute.xlu0 %448 }
  0xfd   : > { %v396_v46 = vmax.f32 %v382_v39, 0.0 }
  0xfe   : > { %v387_v42 = vpop.f32.mrb[6].mxu0  ;;  %751 = vmatprep.subr.bf16.mxu0 %v750_v38  ;;  %758 = vmatprep.subr.bf16.mxu1 %v750_v38  ;;  %v397_v48 = vmax.f32 %v384_v41, 0.0 }
  0xff   : > { %v388_v43 = vadd.f32 %v387_v42, %v281_v40  ;;  %v389_v44 = vpop.f32.mrb[7].mxu0  ;;  %753 = vmatpush1.bf16.msra.mxu0 %v752_v36  ;;  %760 = vmatpush1.bf16.msra.mxu1 %v752_v36 }
 0x100   : > { %v390_v45 = vadd.f32 %v389_v44, %v281_v40  ;;  %v454_v44 = vpop.permute.xlu1 %453 }
 0x101   : > { %v398_v47 = vmax.f32 %v388_v43, 0.0 }
 0x102   : > { %v399_v49 = vmax.f32 %v390_v45, 0.0 }
 0x103   : > { %v756_v50 = vpack.c.bf16 %v398_v47, %v396_v46 }
 0x104   : > { %v754_v51 = vpack.c.bf16 %v399_v49, %v397_v48 }
 0x106   : > { %755 = vmatprep.subr.bf16.mxu0 %v754_v51  ;;  %759 = vmatprep.subr.bf16.mxu1 %v754_v51 }
 0x107   : > { %757 = vmatpush1.bf16.msra.mxu0 %v756_v50  ;;  %761 = vmatpush1.bf16.msra.mxu1 %v756_v50 }
 0x10a   : > { %735 = vmatmul.mubr.msk.f32.vlgmr.msra.gmra.mrb[8].mxu0 %vm456_vm2, %v400_v52  ;;  %737 = vmatmul.mubr.msk.f32.vlgmr.msra.gmra.mrb[0].mxu1 %vm456_vm2, %v402_v53 }
 0x10b   : > { %551 = vmatprep.mubr.f32.mxu0 %v904_v0  ;;  %563 = vmatprep.mubr.f32.mxu1 %v904_v0 }
 0x10e   : > { %736 = vmatmul.mubr.msk.f32.gmra.mrb[10].mxu0 %vm456_vm2, %v401_v54  ;;  %738 = vmatmul.mubr.msk.f32.gmra.mrb[2].mxu1 %vm456_vm2, %v403_v55 }
 0x10f   : > { %569 = vmatprep.mubr.f32.mxu1 %v904_v0 }
 0x112   : > { %739 = vmatmul.mubr.msk.f32.gmra.mrb[4].mxu1 %vm456_vm2, %v404_v56 }
 0x113   : > { %575 = vmatprep.mubr.f32.mxu1 %v904_v0 }
 0x116   : > { %740 = vmatmul.mubr.msk.f32.gmra.mrb[6].mxu1 %vm456_vm2, %v405_v57 }
 0x117   : > { %581 = vmatprep.mubr.f32.mxu1 %v904_v0 }
 0x11a   : > { %741 = vmatmul.mubr.msk.f32.gmra.mrb[8].mxu1 %vm456_vm2, %v406_v58 }
 0x11b   : > { %587 = vmatprep.mubr.f32.mxu1 %v904_v0 }
 0x11e   : > { %742 = vmatmul.mubr.msk.f32.gmra.mrb[10].mxu1 %vm456_vm2, %v407_v59 }
 0x1dd   : > { %v547_v63 = vpop.f32.mrb[8].mxu0  ;;  %v559_v1 = vpop.f32.mrb[0].mxu1 }
 0x1de   : > { %v548_v2 = vadd.f32 %v547_v63, %v419_v60  ;;  %v560_v3 = vadd.f32 %v559_v1, %v429_v62  ;;  %v549_v4 = vpop.f32.mrb[9].mxu0  ;;  %v561_v5 = vpop.f32.mrb[1].mxu1 }
 0x1df   : > { %v550_v6 = vadd.f32 %v549_v4, %v419_v60  ;;  %v562_v0 = vadd.f32 %v561_v5, %v429_v62 }
 0x1e0   : > { %v594_v8 = vmax.f32 %v548_v2, 0.0  ;;  %v598_v9 = vmax.f32 %v560_v3, 0.0 }
 0x1e1   : > { %v595_v10 = vmax.f32 %v550_v6, 0.0  ;;  %v599_v11 = vmax.f32 %v562_v0, 0.0  ;;  %v553_v12 = vpop.f32.mrb[10].mxu0  ;;  %v565_v13 = vpop.f32.mrb[2].mxu1 }
 0x1e2   : > { %610 = vst [vmem:[%s1098_s17] sm:$0xff] %v594_v8  ;;  %614 = vst [vmem:[%s1098_s17 + $0x20] sm:$0xff] %v598_v9  ;;  %v554_v14 = vadd.f32 %v553_v12, %v424_v61  ;;  %v566_v15 = vadd.f32 %v565_v13, %v434_v7  ;;  %v555_v16 = vpop.f32.mrb[11].mxu0  ;;  %v567_v17 = vpop.f32.mrb[3].mxu1 }
 0x1e3   : > { %611 = vst [vmem:[%s1098_s17 + $0x8] sm:$0xff] %v595_v10  ;;  %615 = vst [vmem:[%s1098_s17 + $0x28] sm:$0xff] %v599_v11  ;;  %v556_v18 = vadd.f32 %v555_v16, %v424_v61  ;;  %v568_v19 = vadd.f32 %v567_v17, %v434_v7 }
 0x1e4   : > { %v596_v20 = vmax.f32 %v554_v14, 0.0  ;;  %v600_v21 = vmax.f32 %v566_v15, 0.0 }
 0x1e5   : > { %v597_v23 = vmax.f32 %v556_v18, 0.0  ;;  %v601_v24 = vmax.f32 %v568_v19, 0.0  ;;  %v571_v25 = vpop.f32.mrb[4].mxu1 }
 0x1e6   : > { %612 = vst [vmem:[%s1098_s17 + $0x10] sm:$0xff] %v596_v20  ;;  %616 = vst [vmem:[%s1098_s17 + $0x30] sm:$0xff] %v600_v21  ;;  %v572_v26 = vadd.f32 %v571_v25, %v439_v22  ;;  %v573_v27 = vpop.f32.mrb[5].mxu1 }
 0x1e7   : > { %613 = vst [vmem:[%s1098_s17 + $0x18] sm:$0xff] %v597_v23  ;;  %617 = vst [vmem:[%s1098_s17 + $0x38] sm:$0xff] %v601_v24  ;;  %v574_v28 = vadd.f32 %v573_v27, %v439_v22 }
 0x1e8   : > { %v602_v29 = vmax.f32 %v572_v26, 0.0 }
 0x1e9   : > { %v603_v31 = vmax.f32 %v574_v28, 0.0  ;;  %v577_v32 = vpop.f32.mrb[6].mxu1 }
 0x1ea   : > { %618 = vst [vmem:[%s1098_s17 + $0x40] sm:$0xff] %v602_v29  ;;  %v578_v33 = vadd.f32 %v577_v32, %v444_v30  ;;  %v579_v34 = vpop.f32.mrb[7].mxu1 }
 0x1eb   : > { %619 = vst [vmem:[%s1098_s17 + $0x48] sm:$0xff] %v603_v31  ;;  %v580_v35 = vadd.f32 %v579_v34, %v444_v30 }
 0x1ec   : > { %v604_v36 = vmax.f32 %v578_v33, 0.0 }
 0x1ed   : > { %v605_v38 = vmax.f32 %v580_v35, 0.0  ;;  %v583_v39 = vpop.f32.mrb[8].mxu1 }
 0x1ee   : > { %620 = vst [vmem:[%s1098_s17 + $0x50] sm:$0xff] %v604_v36  ;;  %v584_v40 = vadd.f32 %v583_v39, %v449_v37  ;;  %v585_v41 = vpop.f32.mrb[9].mxu1 }
 0x1ef   : > { %621 = vst [vmem:[%s1098_s17 + $0x58] sm:$0xff] %v605_v38  ;;  %v586_v42 = vadd.f32 %v585_v41, %v449_v37 }
 0x1f0   : > { %v606_v43 = vmax.f32 %v584_v40, 0.0 }
 0x1f1   : > { %v607_v45 = vmax.f32 %v586_v42, 0.0  ;;  %v589_v46 = vpop.f32.mrb[10].mxu1 }
 0x1f2   : > { %622 = vst [vmem:[%s1098_s17 + $0x60] sm:$0xff] %v606_v43  ;;  %v590_v47 = vadd.f32 %v589_v46, %v454_v44  ;;  %v591_v48 = vpop.f32.mrb[11].mxu1 }
 0x1f3   : > { %623 = vst [vmem:[%s1098_s17 + $0x68] sm:$0xff] %v607_v45  ;;  %v592_v49 = vadd.f32 %v591_v48, %v454_v44 }
 0x1f4   : > { %v608_v50 = vmax.f32 %v590_v47, 0.0 }
 0x1f5   : > { %v609_v51 = vmax.f32 %v592_v49, 0.0 }
 0x1f6   : > { %624 = vst [vmem:[%s1098_s17 + $0x70] sm:$0xff] %v608_v50 }
 0x1f7   : > { %625 = vst [vmem:[%s1098_s17 + $0x78] sm:$0xff] %v609_v51 }
 0x1f8   : > { %837 = shalt.err (!%p834_p5)
}
 0x1f9   : > { %s838_s12 = scalar_lea.hbm %s1119_s7, 2048  ;;  %s842_s15 = scalar_lea.hbm %s1178_s5, 4096 }
 0x1fa   : > { %p839_p6 = scmp.ne.s32.totalorder %s1119_s7, %s838_s12  ;;  %p843_p10 = scmp.lt.u32.totalorder %s1119_s7, %s1178_s5 }
 0x1fb   : > { %p844_p11 = scmp.lt.u32.totalorder %s842_s15, %s838_s12  ;;  %p846_p13 = scmp.lt.u32.totalorder %s838_s12, %s1119_s7 }
 0x1fc   : > { %p840_p7 = pnand %p839_p6, %p979_p4 }
 0x1fd   : > { %p845_p12 = por %p844_p11, %p843_p10 }
 0x1fe   : > { %p841_p9 = pneg %p840_p7 }
 0x1ff   : > { %p847_p0 = por %p846_p13, %p845_p12 }
 0x201   : > { %p848_p1 = pnand %p847_p0, %p841_p9 }
 0x203   : > { %851 = shalt.err (!%p848_p1)
}
 0x204   : > { %s907_s24 = smov 256   ;;  %s908_s27 = smov 16  }
 0x205   : > { %762 = dma.vmem_to_hbm [thread:$0]  (%p979_p4), %s1121_s25, 2048, %s1119_s7, %s1127_s21, %s907_s24, %s907_s24, %s908_s27  }
 0x206 PF: > { %p768_p2 = scmp.ge.s32.totalorder %s902_s23, 2  ;;  %s657_s29 = sand.u32 1, %s882_s18  }
 0x207   : > { %s658_s8 = scalar_lea.sflag [#allocation3], %s657_s29 }
 0x208   : > { %p765_p3 = pnand %p768_p2, %p986_p8 }
 0x20a   : > { %877 = dma.done.wait (!%p765_p3), %s658_s8, 2048  }
 0x20b   : > { %879 = vsyncadd (!%p765_p3), %s658_s8, 4294965248  ;;  %s18_s23 = sadd.s32 1, %s902_s23   ;;  %s1181_s18 = smov %s886_s19 }
 0x20c   : > { %p15_p5 = scmp.ge.s32.totalorder %s18_s23, 4   ;;  %s1182_s19 = smov %s890_s20 }
 0x20d   : > { %s1183_s20 = smov %s992_s6  ;;  %s1184_s21 = smov %s898_s22 }
 0x20e   : > { %s1185_s22 = smov %s1187_s26  ;;  %17 = sbr.rel (!%p15_p5) target bundleno = 4 (0x4), region = 75 }
 0x215   :  { %663 = vsyncpa [#allocation3], 1 }
 0x216   :  { %665 = vsyncpa [#allocation3 + $0x1], 1 }

</bundles_post_ra>
